<compile_context>
chip_gen: v6e
topology: v6e:2x2x1
jax: 0.10.0
libtpu: 0.0.40
codegen_flags: <defaults>
</compile_context>

<pallas_src>
import jax
import jax.numpy as jnp
from jax.experimental import pallas as pl
from jax.experimental.pallas import tpu as pltpu


def _embedding_kernel(patch_ref, w1_ref, b1_ref, wse1_ref, bse1_ref,
                      wse2_ref, bse2_ref, w2_ref, b2_ref, o_ref):
    # patch_ref: (Nb, P, Kinp) bf16     w1_ref: (Kinp, Ep) bf16   b1_ref: (1, Ep) f32
    # wse1_ref:  (Ep, Emid)   f32       bse1_ref: (1, Emid) f32
    # wse2_ref:  (Emid, Ep)   f32       bse2_ref: (1, Ep)   f32
    # w2_ref:    (Ep, D)      bf16      b2_ref:   (1, D)    f32
    # o_ref:     (Nb, P, D)
    nb, p, kin = patch_ref.shape
    d = o_ref.shape[-1]

    # Patchify conv (+ folded BN) + SiLU as ONE batched MXU matmul, M = Nb*P.
    a = patch_ref[...].reshape(nb * p, kin)
    y = jnp.dot(a, w1_ref[...], preferred_element_type=jnp.float32) + b1_ref[...]
    y = y * jax.nn.sigmoid(y)                                   # SiLU, (Nb*P, Ep) f32
    e = y.shape[-1]
    y3 = y.reshape(nb, p, e)                                    # free view (P % 8 == 0)

    # SE squeeze (per-example spatial mean) + excitation, once for all Nb examples.
    pooled = jnp.mean(y3, axis=1)                               # (Nb, Ep) f32
    z = jnp.dot(pooled, wse1_ref[...],
                preferred_element_type=jnp.float32) + bse1_ref[...]      # (Nb, Emid)
    z = z * jax.nn.sigmoid(z)                                   # SiLU
    gate = jax.nn.sigmoid(
        jnp.dot(z, wse2_ref[...],
                preferred_element_type=jnp.float32) + bse2_ref[...])     # (Nb, Ep)

    # Channel gate, then 1x1 projection conv (+ folded BN, no act).  The store
    # is already in the module's final (batch, tokens, channels) layout.
    yg = (y3 * gate[:, None, :]).astype(w2_ref.dtype).reshape(nb * p, e)
    out = jnp.dot(yg, w2_ref[...], preferred_element_type=jnp.float32) + b2_ref[...]
    o_ref[...] = out.reshape(nb, p, d).astype(o_ref.dtype)


def _round_up(v, m):
    return (v + m - 1) // m * m


def _vmem_limit_bytes():
    """VMEM scoped-limit target: half of physical capacity, capped at 64 MiB.
    v5e/v6e (128 MiB) -> 64 MiB, v7x (64 MiB per TC) -> 32 MiB."""
    cap = 64 << 20
    try:
        info = pltpu.get_tpu_info()
        c = getattr(info, "vmem_capacity_bytes", None)
        if c:
            cap = int(c)
    except Exception:
        pass
    return max(32 << 20, min(cap // 2, 64 << 20))


def _pick_batch_block(n, per_example_bytes, weight_bytes, vmem_limit, batch_block=None):
    if batch_block is not None:
        return max(1, min(int(batch_block), n))
    # Leave 25% of the scoped limit as headroom for compiler scratch; the
    # per-example estimate already includes double buffering + f32 intermediates.
    budget = max(int(vmem_limit) * 3 // 4 - int(weight_bytes), int(per_example_bytes))
    nb = max(1, budget // max(int(per_example_bytes), 1))
    nb = min(nb, n)
    if n >= 2:
        # Keep >= 2 grid steps: balances v7x's two TensorCores under
        # dimension_semantics=("parallel",); costs one ~0.35us step on 1-TC chips.
        nb = min(nb, pl.cdiv(n, 2))
    return max(int(nb), 1)


def embedding_forward(x, params, *, kernel_size=8, stride=8, eps=1e-5,
                      compute_dtype=jnp.bfloat16, batch_block=None):
    """Eval-mode forward of `Embedding`.  x: (N, C_in, H, W) -> (N, P, embed_dim)."""
    assert kernel_size == stride, "patchify conv requires kernel_size == stride"
    N, C_in, H, W = x.shape
    K = kernel_size
    Hp, Wp = H // K, W // K
    P = Hp * Wp
    Kin = C_in * K * K

    w_conv1, b_conv1 = params["conv1_w"], params["conv1_b"]        # (E,C,K,K), (E,)
    E = w_conv1.shape[0]
    w_se1, b_se1 = params["se1_w"], params["se1_b"]                # (Emid,E), (Emid,)
    w_se2, b_se2 = params["se2_w"], params["se2_b"]                # (E,Emid), (E,)
    Emid = w_se1.shape[0]
    w_conv2, b_conv2 = params["conv2_w"], params["conv2_b"]        # (D,E), (D,)
    D = w_conv2.shape[0]

    f32 = jnp.float32
    cdt = jnp.dtype(compute_dtype)

    # Pad hidden width E (lanes of the big intermediates, contraction of the 2nd
    # matmul) and Kin (contraction of the 1st matmul) to multiples of 128.
    Ep = _round_up(E, 128)
    Kinp = _round_up(Kin, 128)
    # NOTE: D (embed_dim) is left unpadded — the output block's last dim equals
    # the full array dim, and padding it would only add wasted HBM writes.

    # ---- host-side layout plumbing: im2col patches, BN folding, padding ----
    patches = x.reshape(N, C_in, Hp, K, Wp, K)
    patches = patches.transpose(0, 2, 4, 1, 3, 5).reshape(N, P, Kin)
    if Kinp != Kin:
        patches = jnp.pad(patches, ((0, 0), (0, 0), (0, Kinp - Kin)))
    patches = patches.astype(cdt)

    s1 = params["bn1_gamma"].astype(f32) / jnp.sqrt(params["bn1_var"].astype(f32) + eps)
    w1_full = (w_conv1.reshape(E, Kin).astype(f32) * s1[:, None]).T           # (Kin, E)
    w1_k = jnp.zeros((Kinp, Ep), f32).at[:Kin, :E].set(w1_full).astype(cdt)
    b1_k = jnp.zeros((1, Ep), f32).at[0, :E].set(
        (b_conv1.astype(f32) - params["bn1_mean"].astype(f32)) * s1
        + params["bn1_beta"].astype(f32))

    wse1_k = jnp.zeros((Ep, Emid), f32).at[:E, :].set(w_se1.astype(f32).T)    # (Ep, Emid)
    bse1_k = b_se1.astype(f32).reshape(1, Emid)
    wse2_k = jnp.zeros((Emid, Ep), f32).at[:, :E].set(w_se2.astype(f32).T)    # (Emid, Ep)
    bse2_k = jnp.zeros((1, Ep), f32).at[0, :E].set(b_se2.astype(f32))

    s2 = params["bn2_gamma"].astype(f32) / jnp.sqrt(params["bn2_var"].astype(f32) + eps)
    w2_full = (w_conv2.astype(f32) * s2[:, None]).T                           # (E, D)
    w2_k = jnp.zeros((Ep, D), f32).at[:E, :].set(w2_full).astype(cdt)
    b2_k = ((b_conv2.astype(f32) - params["bn2_mean"].astype(f32)) * s2
            + params["bn2_beta"].astype(f32)).reshape(1, D)

    # ---- block sizing against the per-generation VMEM budget ----
    cdt_size = cdt.itemsize
    out_size = jnp.dtype(x.dtype).itemsize
    per_example = (2 * P * Kinp * cdt_size        # patch block (double-buffered)
                   + 2 * P * D * out_size         # output block (double-buffered)
                   + P * Ep * 4                   # y  (f32 intermediate)
                   + P * Ep * cdt_size            # yg (compute-dtype intermediate)
                   + P * D * 4)                   # projection accumulator (f32)
    # Constant-index weight blocks are still double-buffered by the pipeliner;
    # account for that instead of using pl.Buffered(1).
    weight_bytes = 2 * ((Kinp * Ep + Ep * D) * cdt_size
                        + (2 * Ep * Emid + Emid + 2 * Ep + D) * 4)
    vmem_limit = _vmem_limit_bytes()
    Nb = _pick_batch_block(N, per_example, weight_bytes, vmem_limit, batch_block)
    grid = (pl.cdiv(N, Nb),)

    const2 = lambda b: (0, 0)
    cost = pl.CostEstimate(
        flops=int(2 * N * P * (Kinp * Ep + Ep * D) + 4 * N * Ep * Emid),
        transcendentals=int(N * (P * Ep + Ep + 2 * Emid)),
        bytes_accessed=int(N * P * (Kinp * cdt_size + D * out_size)
                           + (Kinp * Ep + Ep * D) * cdt_size
                           + (2 * Ep * Emid + Emid + 2 * Ep + Ep + D) * 4),
    )

    out = pl.pallas_call(
        _embedding_kernel,
        out_shape=jax.ShapeDtypeStruct((N, P, D), x.dtype),
        grid=grid,
        in_specs=[
            pl.BlockSpec((Nb, P, Kinp), lambda b: (b, 0, 0)),  # patches
            pl.BlockSpec((Kinp, Ep), const2),                  # conv1 weight (BN folded)
            pl.BlockSpec((1, Ep), const2),                     # conv1/BN1 bias
            pl.BlockSpec((Ep, Emid), const2),                  # SE reduce weight (transposed)
            pl.BlockSpec((1, Emid), const2),                   # SE reduce bias
            pl.BlockSpec((Emid, Ep), const2),                  # SE expand weight (transposed)
            pl.BlockSpec((1, Ep), const2),                     # SE expand bias
            pl.BlockSpec((Ep, D), const2),                     # conv2 weight (BN folded)
            pl.BlockSpec((1, D), const2),                      # conv2/BN2 bias
        ],
        out_specs=pl.BlockSpec((Nb, P, D), lambda b: (b, 0, 0)),
        compiler_params=pltpu.CompilerParams(
            dimension_semantics=("parallel",),
            vmem_limit_bytes=int(vmem_limit)),
        cost_estimate=cost,
    )(patches, w1_k, b1_k, wse1_k, bse1_k, wse2_k, bse2_k, w2_k, b2_k)

    return out


def _embedding_reference(x, params, *, kernel_size=8, stride=8, eps=1e-5):
    """Pure-JAX reference (eval-mode BN), independent of the im2col trick."""
    f32 = jnp.float32
    hp = jax.lax.Precision.HIGHEST

    def bn(y, g, b, m, v):
        return ((y - m[None, :, None, None])
                / jnp.sqrt(v[None, :, None, None] + eps)
                * g[None, :, None, None] + b[None, :, None, None])

    y = jax.lax.conv_general_dilated(
        x.astype(f32), params["conv1_w"].astype(f32),
        window_strides=(stride, stride), padding="VALID",
        dimension_numbers=("NCHW", "OIHW", "NCHW"), precision=hp)
    y = y + params["conv1_b"][None, :, None, None]
    y = bn(y, params["bn1_gamma"], params["bn1_beta"],
           params["bn1_mean"], params["bn1_var"])
    y = y * jax.nn.sigmoid(y)                                        # SiLU

    pooled = jnp.mean(y, axis=(2, 3))                                # (N, E)
    z = pooled @ params["se1_w"].T + params["se1_b"]
    z = z * jax.nn.sigmoid(z)
    gate = jax.nn.sigmoid(z @ params["se2_w"].T + params["se2_b"])   # (N, E)
    y = y * gate[:, :, None, None]

    y = jnp.einsum("nehw,de->ndhw", y, params["conv2_w"].astype(f32), precision=hp)
    y = y + params["conv2_b"][None, :, None, None]
    y = bn(y, params["bn2_gamma"], params["bn2_beta"],
           params["bn2_mean"], params["bn2_var"])

    n, d, hh, ww = y.shape
    return y.transpose(0, 2, 3, 1).reshape(n, hh * ww, d).astype(x.dtype)


if __name__ == "__main__":
    # Shapes consistent with Embedding(in_chan=4, embed_dim=32, k=8, s=8):
    # Fused_MBConv default expansion=2 -> hidden E = 2*in_chan = 8, SE r=4 -> Emid=2.
    N, C_in, H, W = 2, 4, 32, 32
    embed_dim = 32
    K = 8
    E = 2 * C_in
    Emid = max(E // 4, 1)

    keys = jax.random.split(jax.random.PRNGKey(0), 18)

    def rnd(k, shape, scale=0.1):
        return jax.random.normal(k, shape, dtype=jnp.float32) * scale

    params = {
        "conv1_w": rnd(keys[0], (E, C_in, K, K)),
        "conv1_b": rnd(keys[1], (E,)),
        "bn1_gamma": 1.0 + rnd(keys[2], (E,)),
        "bn1_beta": rnd(keys[3], (E,)),
        "bn1_mean": rnd(keys[4], (E,)),
        "bn1_var": 1.0 + jnp.abs(rnd(keys[5], (E,))),
        "se1_w": rnd(keys[6], (Emid, E)),
        "se1_b": rnd(keys[7], (Emid,)),
        "se2_w": rnd(keys[8], (E, Emid)),
        "se2_b": rnd(keys[9], (E,)),
        "conv2_w": rnd(keys[10], (embed_dim, E)),     # 1x1 conv, kernel dims squeezed
        "conv2_b": rnd(keys[11], (embed_dim,)),
        "bn2_gamma": 1.0 + rnd(keys[12], (embed_dim,)),
        "bn2_beta": rnd(keys[13], (embed_dim,)),
        "bn2_mean": rnd(keys[14], (embed_dim,)),
        "bn2_var": 1.0 + jnp.abs(rnd(keys[15], (embed_dim,))),
    }
    x = jax.random.normal(keys[16], (N, C_in, H, W), dtype=jnp.float32)

    # ---- main check ----
    out = embedding_forward(x, params)
    out = jax.block_until_ready(out)
    ref = _embedding_reference(x, params)
    assert out.shape == (N, (H // K) * (W // K), embed_dim), out.shape
    max_err = float(jnp.max(jnp.abs(out - ref)))
    assert jnp.allclose(out, ref, atol=3e-2, rtol=3e-2), f"max abs err {max_err}"

    # ---- ragged-batch check (N % Nb != 0 exercises the masked tail block) ----
    x3 = jax.random.normal(keys[17], (3, C_in, H, W), dtype=jnp.float32)
    out3 = jax.block_until_ready(embedding_forward(x3, params, batch_block=2))
    ref3 = _embedding_reference(x3, params)
    max_err3 = float(jnp.max(jnp.abs(out3 - ref3)))
    assert jnp.allclose(out3, ref3, atol=3e-2, rtol=3e-2), f"ragged max abs err {max_err3}"

    print("KERNEL_OK")
</pallas_src>

<mosaic_0001>
module attributes {stable_mosaic.version = 11 : i64} {
  func.func @_embedding_kernel(%arg0: i32, %arg1: memref<1x16x256xbf16, #tpu.memory_space<vmem>>, %arg2: memref<256x128xbf16, #tpu.memory_space<vmem>>, %arg3: memref<1x128xf32, #tpu.memory_space<vmem>>, %arg4: memref<128x2xf32, #tpu.memory_space<vmem>>, %arg5: memref<1x2xf32, #tpu.memory_space<vmem>>, %arg6: memref<2x128xf32, #tpu.memory_space<vmem>>, %arg7: memref<1x128xf32, #tpu.memory_space<vmem>>, %arg8: memref<128x32xbf16, #tpu.memory_space<vmem>>, %arg9: memref<1x32xf32, #tpu.memory_space<vmem>>, %arg10: memref<1x16x32xf32, #tpu.memory_space<vmem>>) attributes {dimension_semantics = [#tpu.dimension_semantics<parallel>], iteration_bounds = array<i64: 2>, scalar_prefetch = 0 : i64, scratch_operands = 0 : i64, tpu.core_type = #tpu.core_type<tc>, window_params = [{transform_indices = @transform_0, window_bounds = array<i64: 1, 16, 256>}, {pipeline_mode = #tpu.pipeline_mode<synchronous>, transform_indices = @transform_1, window_bounds = array<i64: 256, 128>}, {pipeline_mode = #tpu.pipeline_mode<synchronous>, transform_indices = @transform_2, window_bounds = array<i64: 1, 128>}, {pipeline_mode = #tpu.pipeline_mode<synchronous>, transform_indices = @transform_3, window_bounds = array<i64: 128, 2>}, {pipeline_mode = #tpu.pipeline_mode<synchronous>, transform_indices = @transform_4, window_bounds = array<i64: 1, 2>}, {pipeline_mode = #tpu.pipeline_mode<synchronous>, transform_indices = @transform_5, window_bounds = array<i64: 2, 128>}, {pipeline_mode = #tpu.pipeline_mode<synchronous>, transform_indices = @transform_6, window_bounds = array<i64: 1, 128>}, {pipeline_mode = #tpu.pipeline_mode<synchronous>, transform_indices = @transform_7, window_bounds = array<i64: 128, 32>}, {pipeline_mode = #tpu.pipeline_mode<synchronous>, transform_indices = @transform_8, window_bounds = array<i64: 1, 32>}, {transform_indices = @transform_9, window_bounds = array<i64: 1, 16, 32>}]} {
    %c0 = arith.constant 0 : index
    %c0_0 = arith.constant 0 : index
    %c0_1 = arith.constant 0 : index
    %0 = vector.load %arg1[%c0, %c0_0, %c0_1] : memref<1x16x256xbf16, #tpu.memory_space<vmem>>, vector<1x16x256xbf16>
    %1 = vector.shape_cast %0 : vector<1x16x256xbf16> to vector<16x256xbf16>
    %c0_2 = arith.constant 0 : index
    %c0_3 = arith.constant 0 : index
    %2 = vector.load %arg2[%c0_2, %c0_3] : memref<256x128xbf16, #tpu.memory_space<vmem>>, vector<256x128xbf16>
    %cst = arith.constant dense<0.000000e+00> : vector<16x128xf32>
    %3 = tpu.matmul %1, %2, %cst {dimension_numbers = #tpu.dot_dimension_numbers<[1], [0], [0], [1], [0, 0, 1, 1], [], []>} : vector<16x256xbf16>, vector<256x128xbf16>, vector<16x128xf32> -> vector<16x128xf32>
    %c0_4 = arith.constant 0 : index
    %c0_5 = arith.constant 0 : index
    %4 = vector.load %arg3[%c0_4, %c0_5] : memref<1x128xf32, #tpu.memory_space<vmem>>, vector<1x128xf32>
    %5 = vector.broadcast %4 : vector<1x128xf32> to vector<16x128xf32>
    %6 = arith.addf %3, %5 : vector<16x128xf32>
    %7 = arith.negf %6 : vector<16x128xf32>
    %8 = math.exp %7 : vector<16x128xf32>
    %cst_6 = arith.constant 1.000000e+00 : f32
    %9 = vector.broadcast %cst_6 : f32 to vector<16x128xf32>
    %10 = arith.addf %9, %8 : vector<16x128xf32>
    %11 = arith.divf %9, %10 : vector<16x128xf32>
    %12 = arith.mulf %6, %11 : vector<16x128xf32>
    %13 = vector.shape_cast %12 : vector<16x128xf32> to vector<1x16x128xf32>
    %cst_7 = arith.constant dense<0.000000e+00> : vector<1x128xf32>
    %14 = vector.multi_reduction <add>, %13, %cst_7 [1] : vector<1x16x128xf32> to vector<1x128xf32>
    %cst_8 = arith.constant 1.600000e+01 : f32
    %15 = vector.broadcast %cst_8 : f32 to vector<1x128xf32>
    %16 = arith.divf %14, %15 : vector<1x128xf32>
    %c0_9 = arith.constant 0 : index
    %c0_10 = arith.constant 0 : index
    %17 = vector.load %arg4[%c0_9, %c0_10] : memref<128x2xf32, #tpu.memory_space<vmem>>, vector<128x2xf32>
    %cst_11 = arith.constant dense<0.000000e+00> : vector<1x2xf32>
    %18 = tpu.matmul %16, %17, %cst_11 {dimension_numbers = #tpu.dot_dimension_numbers<[1], [0], [0], [1], [0, 0, 1, 1], [], []>} : vector<1x128xf32>, vector<128x2xf32>, vector<1x2xf32> -> vector<1x2xf32>
    %c0_12 = arith.constant 0 : index
    %c0_13 = arith.constant 0 : index
    %19 = vector.load %arg5[%c0_12, %c0_13] : memref<1x2xf32, #tpu.memory_space<vmem>>, vector<1x2xf32>
    %20 = arith.addf %18, %19 : vector<1x2xf32>
    %21 = arith.negf %20 : vector<1x2xf32>
    %22 = math.exp %21 : vector<1x2xf32>
    %cst_14 = arith.constant 1.000000e+00 : f32
    %23 = vector.broadcast %cst_14 : f32 to vector<1x2xf32>
    %24 = arith.addf %23, %22 : vector<1x2xf32>
    %25 = arith.divf %23, %24 : vector<1x2xf32>
    %26 = arith.mulf %20, %25 : vector<1x2xf32>
    %c0_15 = arith.constant 0 : index
    %c0_16 = arith.constant 0 : index
    %27 = vector.load %arg6[%c0_15, %c0_16] : memref<2x128xf32, #tpu.memory_space<vmem>>, vector<2x128xf32>
    %cst_17 = arith.constant dense<0.000000e+00> : vector<1x128xf32>
    %28 = tpu.matmul %26, %27, %cst_17 {dimension_numbers = #tpu.dot_dimension_numbers<[1], [0], [0], [1], [0, 0, 1, 1], [], []>} : vector<1x2xf32>, vector<2x128xf32>, vector<1x128xf32> -> vector<1x128xf32>
    %c0_18 = arith.constant 0 : index
    %c0_19 = arith.constant 0 : index
    %29 = vector.load %arg7[%c0_18, %c0_19] : memref<1x128xf32, #tpu.memory_space<vmem>>, vector<1x128xf32>
    %30 = arith.addf %28, %29 : vector<1x128xf32>
    %31 = arith.negf %30 : vector<1x128xf32>
    %32 = math.exp %31 : vector<1x128xf32>
    %cst_20 = arith.constant 1.000000e+00 : f32
    %33 = vector.broadcast %cst_20 : f32 to vector<1x128xf32>
    %34 = arith.addf %33, %32 : vector<1x128xf32>
    %35 = arith.divf %33, %34 : vector<1x128xf32>
    %36 = vector.shape_cast %35 : vector<1x128xf32> to vector<1x1x128xf32>
    %37 = vector.broadcast %36 : vector<1x1x128xf32> to vector<1x16x128xf32>
    %38 = arith.mulf %13, %37 : vector<1x16x128xf32>
    %39 = arith.truncf %38 : vector<1x16x128xf32> to vector<1x16x128xbf16>
    %40 = vector.shape_cast %39 : vector<1x16x128xbf16> to vector<16x128xbf16>
    %c0_21 = arith.constant 0 : index
    %c0_22 = arith.constant 0 : index
    %41 = vector.load %arg8[%c0_21, %c0_22] : memref<128x32xbf16, #tpu.memory_space<vmem>>, vector<128x32xbf16>
    %cst_23 = arith.constant dense<0.000000e+00> : vector<16x32xf32>
    %42 = tpu.matmul %40, %41, %cst_23 {dimension_numbers = #tpu.dot_dimension_numbers<[1], [0], [0], [1], [0, 0, 1, 1], [], []>} : vector<16x128xbf16>, vector<128x32xbf16>, vector<16x32xf32> -> vector<16x32xf32>
    %c0_24 = arith.constant 0 : index
    %c0_25 = arith.constant 0 : index
    %43 = vector.load %arg9[%c0_24, %c0_25] : memref<1x32xf32, #tpu.memory_space<vmem>>, vector<1x32xf32>
    %44 = vector.broadcast %43 : vector<1x32xf32> to vector<16x32xf32>
    %45 = arith.addf %42, %44 : vector<16x32xf32>
    %46 = vector.shape_cast %45 : vector<16x32xf32> to vector<1x16x32xf32>
    %c0_26 = arith.constant 0 : index
    %c0_27 = arith.constant 0 : index
    %c0_28 = arith.constant 0 : index
    %47 = vector.load %arg10[%c0_26, %c0_27, %c0_28] : memref<1x16x32xf32, #tpu.memory_space<vmem>>, vector<1x16x32xf32>
    tpu.vector_store %arg10[%c0_26, %c0_27, %c0_28], %46 {strides = array<i32>} : memref<1x16x32xf32, #tpu.memory_space<vmem>>, vector<1x16x32xf32>,
    return
  }
  func.func @transform_0(%arg0: i32) -> (i32, i32, i32) {
    %c0_i32 = arith.constant 0 : i32
    %c0_i32_0 = arith.constant 0 : i32
    %c0_i32_1 = arith.constant 0 : i32
    return %arg0, %c0_i32, %c0_i32_0 : i32, i32, i32
  }
  func.func @transform_1(%arg0: i32) -> (i32, i32) {
    %c0_i32 = arith.constant 0 : i32
    %c0_i32_0 = arith.constant 0 : i32
    %c0_i32_1 = arith.constant 0 : i32
    return %c0_i32, %c0_i32_0 : i32, i32
  }
  func.func @transform_2(%arg0: i32) -> (i32, i32) {
    %c0_i32 = arith.constant 0 : i32
    %c0_i32_0 = arith.constant 0 : i32
    %c0_i32_1 = arith.constant 0 : i32
    return %c0_i32, %c0_i32_0 : i32, i32
  }
  func.func @transform_3(%arg0: i32) -> (i32, i32) {
    %c0_i32 = arith.constant 0 : i32
    %c0_i32_0 = arith.constant 0 : i32
    %c0_i32_1 = arith.constant 0 : i32
    return %c0_i32, %c0_i32_0 : i32, i32
  }
  func.func @transform_4(%arg0: i32) -> (i32, i32) {
    %c0_i32 = arith.constant 0 : i32
    %c0_i32_0 = arith.constant 0 : i32
    %c0_i32_1 = arith.constant 0 : i32
    return %c0_i32, %c0_i32_0 : i32, i32
  }
  func.func @transform_5(%arg0: i32) -> (i32, i32) {
    %c0_i32 = arith.constant 0 : i32
    %c0_i32_0 = arith.constant 0 : i32
    %c0_i32_1 = arith.constant 0 : i32
    return %c0_i32, %c0_i32_0 : i32, i32
  }
  func.func @transform_6(%arg0: i32) -> (i32, i32) {
    %c0_i32 = arith.constant 0 : i32
    %c0_i32_0 = arith.constant 0 : i32
    %c0_i32_1 = arith.constant 0 : i32
    return %c0_i32, %c0_i32_0 : i32, i32
  }
  func.func @transform_7(%arg0: i32) -> (i32, i32) {
    %c0_i32 = arith.constant 0 : i32
    %c0_i32_0 = arith.constant 0 : i32
    %c0_i32_1 = arith.constant 0 : i32
    return %c0_i32, %c0_i32_0 : i32, i32
  }
  func.func @transform_8(%arg0: i32) -> (i32, i32) {
    %c0_i32 = arith.constant 0 : i32
    %c0_i32_0 = arith.constant 0 : i32
    %c0_i32_1 = arith.constant 0 : i32
    return %c0_i32, %c0_i32_0 : i32, i32
  }
  func.func @transform_9(%arg0: i32) -> (i32, i32, i32) {
    %c0_i32 = arith.constant 0 : i32
    %c0_i32_0 = arith.constant 0 : i32
    %c0_i32_1 = arith.constant 0 : i32
    return %arg0, %c0_i32, %c0_i32_0 : i32, i32, i32
  }
}

</mosaic_0001>

<bundles_post_ra>
// kernel: tpu_custom_call.1
= control target key start
LH: loop header
LB: loop body
LE: loop exit
PB: predicated region body
PF: predicated region fallthrough
CT: control target
= control target key end

     0   :  { %14 = vsyncpa [#allocation3], 0  ;;  %s1558_s0 = inlined_call_operand.vmem [shape: bf16[2,16,256], index: 0, kind: input, shape index: {}]   ;;  %s1559_s1 = inlined_call_operand.vmem [shape: bf16[256,128], index: 1, kind: input, shape index: {}]   ;;  %s1560_s2 = inlined_call_operand.vmem [shape: f32[1,128], index: 2, kind: input, shape index: {}]   ;;  %s1561_s3 = inlined_call_operand.vmem [shape: f32[128,2], index: 3, kind: input, shape index: {}]   ;;  %s1562_s4 = inlined_call_operand.vmem [shape: f32[1,2], index: 4, kind: input, shape index: {}]   ;;  %s1563_s5 = inlined_call_operand.vmem [shape: f32[2,128], index: 5, kind: input, shape index: {}]   ;;  %s1564_s6 = inlined_call_operand.vmem [shape: f32[1,128], index: 6, kind: input, shape index: {}]   ;;  %s1565_s7 = inlined_call_operand.vmem [shape: bf16[128,32], index: 7, kind: input, shape index: {}]   ;;  %s1566_s8 = inlined_call_operand.vmem [shape: f32[1,32], index: 8, kind: input, shape index: {}]   ;;  %s1567_s9 = inlined_call_operand.hbm [shape: f32[2,16,32], index: 9, kind: output, shape index: {}]  }
   0x1   :  { %16 = vsyncpa [#allocation3 + $0x1], 0  ;;  %s1282_s30 = smov 0   ;;  %s1284_s10 = smov 0  }
   0x2   :  { %s1286_s11 = smov 0   ;;  %s1288_s12 = smov 0  }
   0x3 LB: > { %s1303_s13 = sadd.s32 4294967295, %s1225_s12   ;;  %s921_s14 = sadd.s32 4294967294, %s1225_s12   ;;  %s1225_s12 = sphi %s1288_s12, %s1575_s12   ;;  %s1221_s11 = sphi %s1286_s11, %s1574_s11   ;;  %s1217_s10 = sphi %s1284_s10, %s1573_s10   ;;  %s1213_s30 = sphi %s1282_s30, %s1572_s30  }
   0x4   : > { %s1307_s15 = sadd.s32 1, %s1225_s12   ;;  %s223_s16 = sadd.s32 1, %s1221_s11 }
   0x5   : > { %s220_s17 = ssub.s32 %s1225_s12, %s1307_s15  ;;  %p233_p0 = scmp.ne.s32.totalorder %s1221_s11, %s1217_s10 }
   0x6   : > { %p221_p1 = scmp.eq.s32.totalorder %s220_s17, 0  ;;  %p234_p2 = scmp.eq.s32.totalorder %s1303_s13, 1 }
   0x7   : > { %p239_p3 = scmp.ne.s32.totalorder %s1217_s10, %s1213_s30  ;;  %p240_p4 = scmp.eq.s32.totalorder %s921_s14, 1 }
   0x8   : > { %s1318_s18 = scalar_select %p221_p1, %s1221_s11, %s223_s16  }
   0x9   : > { %p1320_p5 = por %p234_p2, %p233_p0  ;;  %p1324_p6 = por %p240_p4, %p239_p3 }
   0xa   : > { %1568 = sst [smem:[#allocation5_spill]] %s1318_s18  ;;  %p924_p7 = scmp.ge.s32.totalorder %s1225_s12, 1 }
   0xb   : > { %p290_p8 = scmp.lt.s32.totalorder %s1225_s12, 3 }
   0xd   : > { %p291_p9 = pnand %p924_p7, %p290_p8 }
   0xe   : > { %p326_p10 = scmp.lt.s32.totalorder (!%p291_p9), %s1303_s13, 1  ;;  %s968_s29 = sshll.u32 (!%p291_p9), %s1303_s13, 8 }
   0xf   : > { %294 = sbr.rel (%p291_p9) target bundleno = 981 (0x3d5), region = 56  ;;  %s1516_s22 = scalar_lea.hbm (!%p291_p9), %s1567_s9, %s968_s29 }
  0x14   : > { %v1122_v0 = vld [vmem:[%s1559_s1 + $0x78] sm:$0xff]   ;;  %v1124_v2 = vld [vmem:[%s1559_s1 + $0x70] sm:$0xff]   ;;  %v1126_v4 = vld [vmem:[%s1559_s1 + $0x68] sm:$0xff]   ;;  %s327_s21 = scalar_select %p326_p10, %s1303_s13, 1  ;;  %v1227_v18 = vmov 0.0   ;;  %vm1228_vm0 = vmmov 0  }
  0x15   : > { %v1123_v1 = vld [vmem:[%s1559_s1 + $0x38] sm:$0xff]   ;;  %969 = vmatprep.subr.bf16.mxu0 %v1122_v0  ;;  %v1125_v3 = vld [vmem:[%s1559_s1 + $0x30] sm:$0xff]   ;;  %v1127_v5 = vld [vmem:[%s1559_s1 + $0x28] sm:$0xff]   ;;  %1019 = vmatprep.subr.mxu1 %v1227_v18  ;;  %vm643_vm1 = vcmask 1041408   ;;  %vm639_vm2 = vcmask 15360   ;;  %vm842_vm3 = vcmask 261120  }
  0x16   : > { %970 = vmatpush3.bf16.msra.mxu0 %v1123_v1  ;;  %v1128_v6 = vld [vmem:[%s1559_s1 + $0x60] sm:$0xff]   ;;  %s967_s26 = sshll.u32 %s327_s21, 4  ;;  %v1130_v8 = vld [vmem:[%s1559_s1 + $0x58] sm:$0xff]   ;;  %v1132_v10 = vld [vmem:[%s1559_s1 + $0x50] sm:$0xff]   ;;  %1051 = vmatprep.mubr.msk.f32.mxu1 %vm1228_vm0, %v1227_v18  ;;  %s1229_s13 = smov [#allocation2]  }
  0x17   : > { %971 = vmatprep.subr.bf16.mxu0 %v1124_v2  ;;  %v1129_v7 = vld [vmem:[%s1559_s1 + $0x20] sm:$0xff]   ;;  %s330_s16 = scalar_lea.vmem %s1558_s0, %s967_s26  ;;  %v1131_v9 = vld [vmem:[%s1559_s1 + $0x18] sm:$0xff]   ;;  %v1133_v11 = vld [vmem:[%s1559_s1 + $0x10] sm:$0xff]   ;;  %s1169_s24 = sshll.u32 %s1229_s13, 4  ;;  %s1170_s24 = int_to_ptr.vmem [resolvable:$false] %s1169_s24 }
  0x18   : > { %v1140_v12 = vld [vmem:[%s330_s16 + $0x4] ss:$8 sps:$4 sm:$0xff]   ;;  %v1138_v17 = vld [vmem:[%s330_s16] ss:$8 sps:$4 sm:$0xff]   ;;  %v558_v19 = vld [vmem:[%s1561_s3 + $0x78] sm:$0xff]  ;;  %s323_s16 = sand.u32 1, %s1217_s10  }
  0x19   : > { %v1134_v13 = vld [vmem:[%s1559_s1 + $0x48] sm:$0xff]   ;;  %511 = vmatprep.mubr.bf16.mxu0 %v1140_v12  ;;  %v1136_v15 = vld [vmem:[%s1559_s1 + $0x40] sm:$0xff]   ;;  %1020 = vmatpush3.msra.mxu1 %v558_v19  ;;  %v557_v20 = vld [vmem:[%s1561_s3 + $0x70] sm:$0xff]  ;;  %s925_s25 = sshll.u32 %s323_s16, 4  ;;  %s1518_s23 = scalar_lea.sflag [#allocation3], %s323_s16 }
  0x1a   : > { %972 = vmatpush3.bf16.msra.mxu0 %v1125_v3  ;;  %v1135_v14 = vld [vmem:[%s1559_s1 + $0x8] sm:$0xff]   ;;  %v1137_v16 = vld [vmem:[%s1559_s1] sm:$0xff]   ;;  %1021 = vmatprep.subr.mxu1 %v1227_v18  ;;  %v554_v23 = vld [vmem:[%s1561_s3 + $0x58] sm:$0xff]  ;;  %s325_s26 = scalar_lea.vmem [#allocation2], %s925_s25  ;;  %s1171_s25 = scalar_lea.vmem %s1170_s24, 512 }
  0x1b   : > { %973 = vmatprep.subr.bf16.mxu0 %v1126_v4  ;;  %1022 = vmatpush3.msra.mxu1 %v557_v20  ;;  %v556_v21 = vld [vmem:[%s1561_s3 + $0x68] sm:$0xff]  ;;  %v555_v22 = vld [vmem:[%s1561_s3 + $0x60] sm:$0xff]  ;;  %v553_v24 = vld [vmem:[%s1561_s3 + $0x50] sm:$0xff]  ;;  %s859_s28 = sshll.u32 %s325_s26, 4  ;;  %s1511_s28 = int_to_ptr.vmem [resolvable:$true] %s859_s28 }
  0x1c   : > { %1023 = vmatprep.subr.mxu1 %v1227_v18  ;;  %v552_v25 = vld [vmem:[%s1561_s3 + $0x48] sm:$0xff]  ;;  %v551_v26 = vld [vmem:[%s1561_s3 + $0x40] sm:$0xff]  ;;  %v550_v27 = vld [vmem:[%s1561_s3 + $0x38] sm:$0xff]  ;;  %s1165_s21 = scalar_lea.vmem %s1511_s28, 256  ;;  %p1172_p0 = scmp.lt.s32.totalorder %s1511_s28, %s1170_s24 }
  0x1d   : > { %1024 = vmatpush3.msra.mxu1 %v556_v21  ;;  %v549_v28 = vld [vmem:[%s1561_s3 + $0x30] sm:$0xff]  ;;  %v548_v29 = vld [vmem:[%s1561_s3 + $0x28] sm:$0xff]  ;;  %v547_v30 = vld [vmem:[%s1561_s3 + $0x20] sm:$0xff]  ;;  %p1166_p11 = scmp.ne.s32.totalorder %s1511_s28, %s1165_s21  ;;  %p1173_p1 = scmp.lt.s32.totalorder %s1171_s25, %s1165_s21 }
  0x1e   : > { %974 = vmatpush3.bf16.msra.mxu0 %v1127_v5  ;;  %1025 = vmatprep.subr.mxu1 %v1227_v18  ;;  %v546_v31 = vld [vmem:[%s1561_s3 + $0x18] sm:$0xff]  ;;  %v545_v32 = vld [vmem:[%s1561_s3 + $0x10] sm:$0xff]  ;;  %v544_v33 = vld [vmem:[%s1561_s3 + $0x8] sm:$0xff] }
  0x1f   : > { %975 = vmatprep.subr.bf16.mxu0 %v1128_v6  ;;  %1026 = vmatpush3.msra.mxu1 %v555_v22  ;;  %v543_v34 = vld [vmem:[%s1561_s3] sm:$0xff]  ;;  %v1145_v12 = vld [vmem:[%s1565_s7 + $0x18] sm:$0xff]   ;;  %p1167_p12 = pnand %p1166_p11, %p1320_p5  ;;  %p1174_p2 = por %p1173_p1, %p1172_p0 }
  0x20   : > { %1027 = vmatprep.subr.mxu1 %v1227_v18  ;;  %v928_v36 = vld [vmem:[%s1560_s2] ss:$0 sm:$0xff] }
  0x21   : > { %1028 = vmatpush3.msra.mxu1 %v554_v23  ;;  %v637_v62 = vld [vmem:[%s1563_s5] sm:$0x3]  ;;  %p1168_p13 = pneg %p1167_p12 }
  0x22   : > { %976 = vmatpush3.bf16.msra.mxu0 %v1129_v7  ;;  %1029 = vmatprep.subr.mxu1 %v1227_v18  ;;  %v559_v63 = vld [vmem:[%s1562_s4] sm:$0x1] }
  0x23   : > { %977 = vmatprep.subr.bf16.mxu0 %v1130_v8  ;;  %1030 = vmatpush3.msra.mxu1 %v553_v24  ;;  %v1141_v8 = vld [vmem:[%s1565_s7 + $0x38] sm:$0xff]   ;;  %v723_v24 = vlaneseq  ;;  %p1175_p3 = pnand %p1174_p2, %p1168_p13 }
  0x24   : > { %1031 = vmatprep.subr.mxu1 %v1227_v18 }
  0x25   : > { %1032 = vmatpush3.msra.mxu1 %v552_v25  ;;  %v724_v25 = vshrl.u32 %v723_v24, 7 }
  0x26   : > { %978 = vmatpush3.bf16.msra.mxu0 %v1131_v9  ;;  %1033 = vmatprep.subr.mxu1 %v1227_v18  ;;  %v1142_v9 = vld [vmem:[%s1565_s7 + $0x30] sm:$0xff]  }
  0x27   : > { %979 = vmatprep.subr.bf16.mxu0 %v1132_v10  ;;  %1034 = vmatpush3.msra.mxu1 %v551_v26  ;;  %v1143_v10 = vld [vmem:[%s1565_s7 + $0x28] sm:$0xff]   ;;  %v725_v26 = vsub.s32 0, %v724_v25 }
  0x28   : > { %1035 = vmatprep.subr.mxu1 %v1227_v18 }
  0x29   : > { %1036 = vmatpush3.msra.mxu1 %v550_v27 }
  0x2a   : > { %980 = vmatpush3.bf16.msra.mxu0 %v1133_v11  ;;  %1037 = vmatprep.subr.mxu1 %v1227_v18  ;;  %v1144_v11 = vld [vmem:[%s1565_s7 + $0x20] sm:$0xff]  }
  0x2b   : > { %981 = vmatprep.subr.bf16.mxu0 %v1134_v13  ;;  %1038 = vmatpush3.msra.mxu1 %v549_v28  ;;  %v1146_v13 = vld [vmem:[%s1565_s7 + $0x10] sm:$0xff]  }
  0x2c   : > { %1039 = vmatprep.subr.mxu1 %v1227_v18 }
  0x2d   : > { %1040 = vmatpush3.msra.mxu1 %v548_v29 }
  0x2e   : > { %982 = vmatpush3.bf16.msra.mxu0 %v1135_v14  ;;  %1041 = vmatprep.subr.mxu1 %v1227_v18  ;;  %v1147_v14 = vld [vmem:[%s1565_s7 + $0x8] sm:$0xff]  }
  0x2f   : > { %983 = vmatprep.subr.bf16.mxu0 %v1136_v15  ;;  %1042 = vmatpush3.msra.mxu1 %v547_v30  ;;  %v1148_v15 = vld [vmem:[%s1565_s7] sm:$0xff]  }
  0x30   : > { %1043 = vmatprep.subr.mxu1 %v1227_v18 }
  0x31   : > { %1044 = vmatpush3.msra.mxu1 %v546_v31  ;;  %v953_v31 = vld [vmem:[%s1566_s8] ss:$0 sm:$0xff] }
  0x32   : > { %984 = vmatpush3.bf16.msra.mxu0 %v1137_v16  ;;  %1045 = vmatprep.subr.mxu1 %v1227_v18  ;;  %v638_v16 = vld [vmem:[%s1564_s6] sm:$0x1] }
  0x33   : > { %1059 = vmatprep.subr.bf16.mxu0 %v1227_v18  ;;  %1046 = vmatpush3.msra.mxu1 %v545_v32 }
  0x34   : > { %1047 = vmatprep.subr.mxu1 %v1227_v18 }
  0x35   : > { %512 = vmatmul.mubr.bf16.vlgmr.msra.gmra.mxu0 %v1138_v17  ;;  %1048 = vmatpush3.msra.mxu1 %v544_v33 }
  0x36   : > { %1075 = vmatprep.mubr.msk.bf16.mxu0 %vm1228_vm0, %v1227_v18  ;;  %1049 = vmatprep.subr.mxu1 %v1227_v18 }
  0x37   : > { %1050 = vmatpush3.msra.mxu1 %v543_v34  ;;  %1060 = vmatpush3.bf16.msra.mxu0 %v1141_v8 }
  0x38   : > { %1054 = vmatprep.subr.mxu1 %v1227_v18  ;;  %1061 = vmatprep.subr.bf16.mxu0 %v1227_v18 }
  0x3b   : > { %1062 = vmatpush3.bf16.msra.mxu0 %v1142_v9 }
  0x3c   : > { %1063 = vmatprep.subr.bf16.mxu0 %v1227_v18 }
  0x3f   : > { %1064 = vmatpush3.bf16.msra.mxu0 %v1143_v10 }
  0x40   : > { %1065 = vmatprep.subr.bf16.mxu0 %v1227_v18 }
  0x43   : > { %1066 = vmatpush3.bf16.msra.mxu0 %v1144_v11 }
  0x44   : > { %1067 = vmatprep.subr.bf16.mxu0 %v1227_v18 }
  0x47   : > { %1068 = vmatpush3.bf16.msra.mxu0 %v1145_v12 }
  0x48   : > { %1069 = vmatprep.subr.bf16.mxu0 %v1227_v18 }
  0x4b   : > { %1070 = vmatpush3.bf16.msra.mxu0 %v1146_v13 }
  0x4c   : > { %1071 = vmatprep.subr.bf16.mxu0 %v1227_v18 }
  0x4f   : > { %1072 = vmatpush3.bf16.msra.mxu0 %v1147_v14 }
  0x50   : > { %1073 = vmatprep.subr.bf16.mxu0 %v1227_v18 }
  0x53   : > { %1074 = vmatpush3.bf16.msra.mxu0 %v1148_v15 }
  0xf5   : > { %v985_v35 = vpop.f32.mrf.mxu0 }
  0xf7   : > { %v986_v37 = vpop.f32.mrf.mxu0 }
  0xf8   : > { %v987_v38 = vadd.f32 %v986_v37, %v985_v35 }
  0xf9   : > { %v988_v39 = vpop.f32.mrf.mxu0 }
  0xfa   : > { %v514_v40 = vadd.f32 %v987_v38, %v928_v36 }
  0xfb   : > { %v989_v41 = vpop.f32.mrf.mxu0 }
  0xfc   : > { %v947_v42 = vmul.f32 -1.442695, %v514_v40  ;;  %v990_v43 = vadd.f32 %v989_v41, %v988_v39 }
  0xfe   : > { %1149 = vpow2.f32 %v947_v42  ;;  %v517_v44 = vadd.f32 %v990_v43, %v928_v36 }
 0x100   : > { %v948_v45 = vmul.f32 -1.442695, %v517_v44 }
 0x102   : > { %1151 = vpow2.f32 %v948_v45 }
 0x10b   : > { %v1150_v46 = vpop.eup %1149 }
 0x10c   : > { %v526_v47 = vadd.f32 1.0, %v1150_v46 }
 0x10e   : > { %1153 = vrcp.f32 %v526_v47 }
 0x10f   : > { %v1152_v48 = vpop.eup %1151 }
 0x110   : > { %v527_v49 = vadd.f32 1.0, %v1152_v48 }
 0x112   : > { %1155 = vrcp.f32 %v527_v49 }
 0x11b   : > { %v1154_v50 = vpop.eup %1153 }
 0x11c   : > { %v1456_v52 = vmul.f32 %v1154_v50, %v514_v40 }
 0x11f   : > { %v1156_v51 = vpop.eup %1155 }
 0x120   : > { %v1458_v53 = vmul.f32 %v1156_v51, %v517_v44 }
 0x122   : > { %v534_v54 = vadd.f32 %v1458_v53, %v1456_v52 }
 0x124   : > { %v535_v55 = vrot.slane %v534_v54, 4 }
 0x126   : > { %v536_v56 = vadd.f32 %v535_v55, %v534_v54 }
 0x128   : > { %v537_v57 = vrot.slane %v536_v56, 2 }
 0x12a   : > { %v538_v58 = vadd.f32 %v537_v57, %v536_v56 }
 0x12c   : > { %v539_v59 = vrot.slane %v538_v58, 1 }
 0x12e   : > { %v540_v60 = vadd.f32 %v539_v59, %v538_v58 }
 0x130   : > { %v542_v61 = vmul.f32 0.0625, %v540_v60 }
 0x132   : > { %1052 = vmatmul.mubr.f32.vlgmr.msra.gmra.mxu1 %v542_v61 }
 0x133   : > { %1056 = vmatprep.mubr.msk.f32.mxu1 %vm1228_vm0, %v1227_v18  ;;  %1055 = vmatpush3.msk.msra.mxu1 %vm643_vm1, %v637_v62 }
 0x1f2   : > { %v626_v0 = vpop.f32.mrf.mxu1 }
 0x1f3   : > { %v627_v1 = vadd.f32 %v626_v0, %v559_v63 }
 0x1f4   : > { %v1053_v2 = vpop.f32.mrf.mxu1 }
 0x1f5   : > { %v949_v3 = vmul.f32 -1.442695, %v627_v1 }
 0x1f7   : > { %1157 = vpow2.f32 %v949_v3 }
 0x204   : > { %v1158_v4 = vpop.eup %1157 }
 0x205   : > { %v633_v5 = vadd.f32 1.0, %v1158_v4 }
 0x207   : > { %1159 = vrcp.f32 %v633_v5 }
 0x214   : > { %v1160_v6 = vpop.eup %1159 }
 0x215   : > { %v636_v7 = vmul.f32 %v1160_v6, %v627_v1 }
 0x217   : > { %1057 = vmatmul.mubr.msk.f32.vlgmr.msra.gmra.mxu1 %vm639_vm2, %v636_v7 }
 0x2d7   : > { %v713_v17 = vpop.f32.mrf.mxu1 }
 0x2d8   : > { %v714_v19 = vadd.f32 %v713_v17, %v638_v16 }
 0x2d9   : > { %v1058_v20 = vpop.f32.mrf.mxu1 }
 0x2da   : > { %v952_v21 = vmul.f32 -1.442695, %v714_v19 }
 0x2dc   : > { %1161 = vpow2.f32 %v952_v21 }
 0x2e9   : > { %v1162_v22 = vpop.eup %1161 }
 0x2ea   : > { %v720_v23 = vadd.f32 1.0, %v1162_v22 }
 0x2ec   : > { %1163 = vrcp.f32 %v720_v23 }
 0x2f9   : > { %v1164_v27 = vpop.eup %1163 }
 0x2fa   : > { %v726_v18 = vrot.slane %v1164_v27, %v725_v26 }
 0x2fc   : > { %v727_v28 = vmul.f32 %v726_v18, %v1456_v52  ;;  %v728_v29 = vmul.f32 %v726_v18, %v1458_v53 }
 0x2fe   : > { %v729_v30 = vpack.c.bf16 %v728_v29, %v727_v28 }
 0x300   : > { %1076 = vmatmul.mubr.bf16.vlgmr.msra.gmra.mxu0 %v729_v30 }
 0x3c0   : > { %v835_v32 = vpop.f32.mrf.mxu0 }
 0x3c1   : > { %v836_v33 = vadd.f32 %v953_v31, %v835_v32 }
 0x3c2   : > { %v1077_v34 = vpop.f32.mrf.mxu0 }
 0x3c3   : > { %843 = vst.msk [vmem:[%s325_s26] sm:$0xff] %vm842_vm3, %v836_v33 }
 0x3c4   : > { %v838_v35 = vpop.f32.mrf.mxu0 }
 0x3c5   : > { %v839_v36 = vadd.f32 %v953_v31, %v838_v35 }
 0x3c6   : > { %v1078_v37 = vpop.f32.mrf.mxu0 }
 0x3c7   : > { %844 = vst.msk [vmem:[%s325_s26 + $0x8] sm:$0xff] %vm842_vm3, %v839_v36 }
 0x3c8   : > { %1178 = shalt.err (!%p1175_p3)
}
 0x3c9   : > { %s1179_s16 = scalar_lea.hbm %s1516_s22, 256  ;;  %s1183_s26 = scalar_lea.hbm %s1567_s9, 512 }
 0x3ca   : > { %p1180_p4 = scmp.ne.s32.totalorder %s1516_s22, %s1179_s16  ;;  %p1184_p9 = scmp.lt.s32.totalorder %s1516_s22, %s1567_s9 }
 0x3cb   : > { %p1185_p10 = scmp.lt.s32.totalorder %s1183_s26, %s1179_s16 }
 0x3cc   : > { %p1181_p7 = pnand %p1180_p4, %p1320_p5 }
 0x3cd   : > { %p1186_p11 = por %p1185_p10, %p1184_p9 }
 0x3ce   : > { %p1182_p8 = pneg %p1181_p7 }
 0x3d0   : > { %p1187_p12 = pnand %p1186_p11, %p1182_p8 }
 0x3d2   : > { %1190 = shalt.err (!%p1187_p12)
}
 0x3d3   : > { %s1230_s17 = smov 128   ;;  %s1231_s21 = smov 8  }
 0x3d4   : > { %1079 = dma.vmem_to_hbm [thread:$0]  (%p1320_p5), %s1511_s28, 256, %s1516_s22, %s1518_s23, %s1230_s17, %s1230_s17, %s1231_s21  }
 0x3d5 PF: > { %p1085_p13 = scmp.ge.s32.totalorder %s1225_s12, 2  ;;  %s874_s13 = sand.u32 1, %s1213_s30  }
 0x3d6   : > { %s875_s24 = scalar_lea.sflag [#allocation3], %s874_s13 }
 0x3d7   : > { %p1082_p0 = pnand %p1085_p13, %p1324_p6 }
 0x3d9   : > { %p1083_p1 = pneg %p1082_p0 }
 0x3db   : > { %1208 = dma.done.wait (%p1083_p1), %s875_s24, 256  }
 0x3dc   : > { %1210 = vsyncadd (%p1083_p1), %s875_s24, 4294967040  ;;  %s1571_s25 = sld [smem:[#allocation5_spill]]  ;;  %p19_p2 = scmp.ge.s32.totalorder %s1307_s15, 4  }
 0x3dd   : > { %s1572_s30 = smov %s1217_s10  ;;  %s1573_s10 = smov %s1221_s11 }
 0x3de   : > { %s1575_s12 = smov %s1307_s15  ;;  %21 = sbr.rel (!%p19_p2) target bundleno = 3 (0x3), region = 91 }
 0x3e2   : > { %s1574_s11 = smov %s1571_s25 }
 0x3e3   :  { %880 = vsyncpa [#allocation3], 1 }
 0x3e4   :  { %882 = vsyncpa [#allocation3 + $0x1], 1 }

</bundles_post_ra>
